<compile_context>
chip_gen: v6e
topology: v6e:2x2x1
jax: 0.10.0
libtpu: 0.0.40
codegen_flags: <defaults>
</compile_context>

<pallas_src>
import functools

import jax
import jax.numpy as jnp
from jax.experimental import pallas as pl
from jax.experimental.pallas import tpu as pltpu


def _round_up(x, m):
    return ((x + m - 1) // m) * m


def _bce_mean_kernel(pred_ref, gt_ref, out_ref, acc_ref, *,
                     total_n, tn, n_j, need_mask):
    s = pl.program_id(0)          # column shard (for 2-TC split on small B)
    j = pl.program_id(2)          # reduction step within the shard
    tb = acc_ref.shape[0]

    @pl.when(j == 0)
    def _():
        acc_ref[...] = jnp.zeros_like(acc_ref)

    # Lane-dense accumulation: process the (tb, tn) tile in 128-lane chunks,
    # accumulate into a (tb, 128) f32 accumulator with VPU adds only.
    n_chunks = tn // 128
    for c in range(n_chunks):
        sl = pl.ds(c * 128, 128)
        x = pred_ref[:, sl].astype(jnp.float32)
        y = gt_ref[:, sl].astype(jnp.float32)
        # Numerically stable BCE-with-logits (matches torch.nn.BCEWithLogitsLoss):
        #   loss = max(x, 0) - x*y + log1p(exp(-|x|))
        loss = jnp.maximum(x, 0.0) - x * y + jnp.log1p(jnp.exp(-jnp.abs(x)))
        if need_mask:
            col = ((s * n_j + j) * tn + c * 128
                   + jax.lax.broadcasted_iota(jnp.int32, (tb, 128), 1))
            loss = jnp.where(col < total_n, loss, 0.0)
        acc_ref[...] += loss

    # Epilogue: single cross-lane reduce + 1/N scale, masked (tb,1) store once.
    @pl.when(j == pl.num_programs(2) - 1)
    def _():
        row_sum = jnp.sum(acc_ref[...], axis=-1, keepdims=True)        # (tb, 1)
        out_ref[...] = (row_sum * (1.0 / total_n)).astype(
            out_ref.dtype).reshape(1, tb, 1)


def cross_entropy(pred_label, gt_label, *, tb=None, tn=None):
    """Pallas implementation of the CrossEntropy module forward.

    pred_label: [B, N] float32 logits
    gt_label:   [B, N] float32 targets in [0, 1]
    returns:    [B] float32 per-row mean BCE-with-logits loss
    """
    B, N = pred_label.shape
    assert gt_label.shape == (B, N)

    # Large, VMEM-safe default tiles (2 MiB/block f32 -> ~8 MiB double-buffered,
    # inside the default scoped-VMEM limit on v5e/v6e/v7x).
    if tb is None:
        tb = min(256, _round_up(B, 8))
    if tn is None:
        tn = min(2048, _round_up(N, 128))
    tb = _round_up(tb, 8)
    tn = _round_up(tn, 128)

    n_row_blocks = pl.cdiv(B, tb)
    n_col_blocks = pl.cdiv(N, tn)
    # v7x megacore: if only one row block exists, split the N reduction into
    # two shards so both TensorCores get work; partials are summed outside.
    num_shards = 2 if (n_row_blocks == 1 and n_col_blocks >= 2) else 1

    B_pad = n_row_blocks * tb
    N_pad = _round_up(N, num_shards * tn)
    n_j = N_pad // (num_shards * tn)
    need_mask = (N_pad != N)

    if (B_pad, N_pad) != (B, N):
        pad = ((0, B_pad - B), (0, N_pad - N))
        pred_label = jnp.pad(pred_label, pad)
        gt_label = jnp.pad(gt_label, pad)

    kernel = functools.partial(_bce_mean_kernel, total_n=N, tn=tn, n_j=n_j,
                               need_mask=need_mask)

    partial = pl.pallas_call(
        kernel,
        out_shape=jax.ShapeDtypeStruct((num_shards, B_pad, 1), jnp.float32),
        grid_spec=pltpu.PrefetchScalarGridSpec(
            num_scalar_prefetch=0,
            grid=(num_shards, n_row_blocks, n_j),
            in_specs=[
                pl.BlockSpec((tb, tn), lambda s, i, j: (i, s * n_j + j)),
                pl.BlockSpec((tb, tn), lambda s, i, j: (i, s * n_j + j)),
            ],
            out_specs=pl.BlockSpec((1, tb, 1), lambda s, i, j: (s, i, 0)),
            scratch_shapes=[pltpu.VMEM((tb, 128), jnp.float32)],
        ),
        compiler_params=pltpu.CompilerParams(
            dimension_semantics=("parallel", "parallel", "arbitrary")
        ),
    )(pred_label, gt_label)

    # Combine column shards (each shard already divided by the full N), strip
    # row padding.
    out = partial.sum(axis=0)[:, 0]
    return out[:B]


def _reference(pred_label, gt_label):
    x = pred_label.astype(jnp.float32)
    y = gt_label.astype(jnp.float32)
    loss = jnp.maximum(x, 0.0) - x * y + jnp.log1p(jnp.exp(-jnp.abs(x)))
    return loss.mean(axis=-1)


if __name__ == "__main__":
    key = jax.random.PRNGKey(0)
    k1, k2, k3, k4 = jax.random.split(key, 4)

    # Aligned small shape (matches the module's [B, N] logits/targets).
    B, N = 8, 256
    pred = jax.random.normal(k1, (B, N), dtype=jnp.float32)
    gt = (jax.random.uniform(k2, (B, N), dtype=jnp.float32) > 0.5).astype(jnp.float32)
    out = cross_entropy(pred, gt)
    jax.block_until_ready(out)
    ref = _reference(pred, gt)
    assert out.shape == (B,)
    assert jnp.allclose(out, ref, atol=1e-5, rtol=1e-5)

    # Ragged shape: exercises padding + in-kernel column masking.
    B2, N2 = 5, 300
    pred2 = jax.random.normal(k3, (B2, N2), dtype=jnp.float32)
    gt2 = (jax.random.uniform(k4, (B2, N2), dtype=jnp.float32) > 0.5).astype(jnp.float32)
    out2 = cross_entropy(pred2, gt2)
    jax.block_until_ready(out2)
    ref2 = _reference(pred2, gt2)
    assert out2.shape == (B2,)
    assert jnp.allclose(out2, ref2, atol=1e-5, rtol=1e-5)

    print("KERNEL_OK")
</pallas_src>

<mosaic_0001>
module attributes {stable_mosaic.version = 11 : i64} {
  func.func @_bce_mean_kernel(%arg0: i32, %arg1: i32, %arg2: i32, %arg3: memref<8x256xf32, #tpu.memory_space<vmem>>, %arg4: memref<8x256xf32, #tpu.memory_space<vmem>>, %arg5: memref<1x8x1xf32, #tpu.memory_space<vmem>>, %arg6: memref<8x128xf32, #tpu.memory_space<vmem>>) attributes {dimension_semantics = [#tpu.dimension_semantics<parallel>, #tpu.dimension_semantics<parallel>, #tpu.dimension_semantics<arbitrary>], iteration_bounds = array<i64: 1, 1, 1>, scalar_prefetch = 0 : i64, scratch_operands = 1 : i64, tpu.core_type = #tpu.core_type<tc>, window_params = [{transform_indices = @transform_0, window_bounds = array<i64: 8, 256>}, {transform_indices = @transform_1, window_bounds = array<i64: 8, 256>}, {transform_indices = @transform_2, window_bounds = array<i64: 1, 8, 1>}]} {
    %c0_i32 = arith.constant 0 : i32
    %0 = arith.cmpi eq, %arg2, %c0_i32 : i32
    %1 = arith.extui %0 : i1 to i32
    %c0_i32_0 = arith.constant 0 : i32
    %2 = arith.cmpi ne, %1, %c0_i32_0 : i32
    scf.if %2 {
      %cst_20 = arith.constant 0.000000e+00 : f32
      %36 = vector.broadcast %cst_20 : f32 to vector<8x128xf32>
      %c0_21 = arith.constant 0 : index
      %c0_22 = arith.constant 0 : index
      %37 = vector.load %arg6[%c0_21, %c0_22] : memref<8x128xf32, #tpu.memory_space<vmem>>, vector<8x128xf32>
      tpu.vector_store %arg6[%c0_21, %c0_22], %36 {strides = array<i32>} : memref<8x128xf32, #tpu.memory_space<vmem>>, vector<8x128xf32>,
    } else {
    }
    %c0 = arith.constant 0 : index
    %c0_1 = arith.constant 0 : index
    %3 = vector.load %arg3[%c0, %c0_1] : memref<8x256xf32, #tpu.memory_space<vmem>>, vector<8x128xf32>
    %c0_2 = arith.constant 0 : index
    %c0_3 = arith.constant 0 : index
    %4 = vector.load %arg4[%c0_2, %c0_3] : memref<8x256xf32, #tpu.memory_space<vmem>>, vector<8x128xf32>
    %cst = arith.constant 0.000000e+00 : f32
    %5 = vector.broadcast %cst : f32 to vector<8x128xf32>
    %6 = arith.maximumf %3, %5 : vector<8x128xf32>
    %7 = arith.mulf %3, %4 : vector<8x128xf32>
    %8 = arith.subf %6, %7 : vector<8x128xf32>
    %9 = math.absf %3 : vector<8x128xf32>
    %cst_4 = arith.constant 0.000000e+00 : f32
    %10 = vector.broadcast %cst_4 : f32 to vector<8x128xf32>
    %11 = arith.subf %10, %9 : vector<8x128xf32>
    %12 = math.exp %11 : vector<8x128xf32>
    %13 = math.log1p %12 : vector<8x128xf32>
    %14 = arith.addf %8, %13 : vector<8x128xf32>
    %c0_5 = arith.constant 0 : index
    %c0_6 = arith.constant 0 : index
    %15 = vector.load %arg6[%c0_5, %c0_6] : memref<8x128xf32, #tpu.memory_space<vmem>>, vector<8x128xf32>
    %16 = arith.addf %15, %14 : vector<8x128xf32>
    %c0_7 = arith.constant 0 : index
    %c0_8 = arith.constant 0 : index
    %17 = vector.load %arg6[%c0_7, %c0_8] : memref<8x128xf32, #tpu.memory_space<vmem>>, vector<8x128xf32>
    tpu.vector_store %arg6[%c0_7, %c0_8], %16 {strides = array<i32>} : memref<8x128xf32, #tpu.memory_space<vmem>>, vector<8x128xf32>,
    %c0_9 = arith.constant 0 : index
    %c128 = arith.constant 128 : index
    %18 = vector.load %arg3[%c0_9, %c128] : memref<8x256xf32, #tpu.memory_space<vmem>>, vector<8x128xf32>
    %c0_10 = arith.constant 0 : index
    %c128_11 = arith.constant 128 : index
    %19 = vector.load %arg4[%c0_10, %c128_11] : memref<8x256xf32, #tpu.memory_space<vmem>>, vector<8x128xf32>
    %cst_12 = arith.constant 0.000000e+00 : f32
    %20 = vector.broadcast %cst_12 : f32 to vector<8x128xf32>
    %21 = arith.maximumf %18, %20 : vector<8x128xf32>
    %22 = arith.mulf %18, %19 : vector<8x128xf32>
    %23 = arith.subf %21, %22 : vector<8x128xf32>
    %24 = math.absf %18 : vector<8x128xf32>
    %cst_13 = arith.constant 0.000000e+00 : f32
    %25 = vector.broadcast %cst_13 : f32 to vector<8x128xf32>
    %26 = arith.subf %25, %24 : vector<8x128xf32>
    %27 = math.exp %26 : vector<8x128xf32>
    %28 = math.log1p %27 : vector<8x128xf32>
    %29 = arith.addf %23, %28 : vector<8x128xf32>
    %c0_14 = arith.constant 0 : index
    %c0_15 = arith.constant 0 : index
    %30 = vector.load %arg6[%c0_14, %c0_15] : memref<8x128xf32, #tpu.memory_space<vmem>>, vector<8x128xf32>
    %31 = arith.addf %30, %29 : vector<8x128xf32>
    %c0_16 = arith.constant 0 : index
    %c0_17 = arith.constant 0 : index
    %32 = vector.load %arg6[%c0_16, %c0_17] : memref<8x128xf32, #tpu.memory_space<vmem>>, vector<8x128xf32>
    tpu.vector_store %arg6[%c0_16, %c0_17], %31 {strides = array<i32>} : memref<8x128xf32, #tpu.memory_space<vmem>>, vector<8x128xf32>,
    %c0_i32_18 = arith.constant 0 : i32
    %33 = arith.cmpi eq, %arg2, %c0_i32_18 : i32
    %34 = arith.extui %33 : i1 to i32
    %c0_i32_19 = arith.constant 0 : i32
    %35 = arith.cmpi ne, %34, %c0_i32_19 : i32
    scf.if %35 {
      %c0_20 = arith.constant 0 : index
      %c0_21 = arith.constant 0 : index
      %36 = vector.load %arg6[%c0_20, %c0_21] : memref<8x128xf32, #tpu.memory_space<vmem>>, vector<8x128xf32>
      %cst_22 = arith.constant dense<0.000000e+00> : vector<8xf32>
      %37 = vector.multi_reduction <add>, %36, %cst_22 [1] : vector<8x128xf32> to vector<8xf32>
      %38 = vector.shape_cast %37 : vector<8xf32> to vector<8x1xf32>
      %cst_23 = arith.constant 3.906250e-03 : f32
      %39 = vector.broadcast %cst_23 : f32 to vector<8x1xf32>
      %40 = arith.mulf %38, %39 : vector<8x1xf32>
      %41 = vector.shape_cast %40 : vector<8x1xf32> to vector<1x8x1xf32>
      %c0_24 = arith.constant 0 : index
      %c0_25 = arith.constant 0 : index
      %c0_26 = arith.constant 0 : index
      %42 = vector.load %arg5[%c0_24, %c0_25, %c0_26] : memref<1x8x1xf32, #tpu.memory_space<vmem>>, vector<1x8x1xf32>
      tpu.vector_store %arg5[%c0_24, %c0_25, %c0_26], %41 {strides = array<i32>} : memref<1x8x1xf32, #tpu.memory_space<vmem>>, vector<1x8x1xf32>,
    } else {
    }
    return
  }
  func.func @transform_0(%arg0: i32, %arg1: i32, %arg2: i32) -> (i32, i32) {
    %c1_i32 = arith.constant 1 : i32
    %0 = arith.muli %arg0, %c1_i32 : i32
    %1 = arith.addi %0, %arg2 : i32
    %c0_i32 = arith.constant 0 : i32
    return %arg1, %1 : i32, i32
  }
  func.func @transform_1(%arg0: i32, %arg1: i32, %arg2: i32) -> (i32, i32) {
    %c1_i32 = arith.constant 1 : i32
    %0 = arith.muli %arg0, %c1_i32 : i32
    %1 = arith.addi %0, %arg2 : i32
    %c0_i32 = arith.constant 0 : i32
    return %arg1, %1 : i32, i32
  }
  func.func @transform_2(%arg0: i32, %arg1: i32, %arg2: i32) -> (i32, i32, i32) {
    %c0_i32 = arith.constant 0 : i32
    %c0_i32_0 = arith.constant 0 : i32
    return %arg0, %arg1, %c0_i32 : i32, i32, i32
  }
}

</mosaic_0001>

<bundles_post_ra>
// kernel: tpu_custom_call.1
= control target key start
LH: loop header
LB: loop body
LE: loop exit
PB: predicated region body
PF: predicated region fallthrough
CT: control target
= control target key end

     0   :  { %7 = vsyncpa [#allocation4], 0  ;;  %s191_s0 = inlined_call_operand.hbm [shape: f32[8,256], index: 0, kind: input, shape index: {}]   ;;  %s192_s1 = inlined_call_operand.hbm [shape: f32[8,256], index: 1, kind: input, shape index: {}]   ;;  %s193_s2 = inlined_call_operand.vmem [shape: f32[1,8,1], index: 2, kind: output, shape index: {}]  }
   0x1   :  { %8 = vsyncpa [#allocation6], 0  ;;  %s165_s9 = smov [#allocation3]   ;;  %s166_s11 = smov [#allocation5]  }
   0x2   :  { %s19_s10 = sshll.u32 %s165_s9, 4  ;;  %s33_s12 = sshll.u32 %s166_s11, 4  ;;  %s20_s10 = int_to_ptr.vmem [resolvable:$true] %s19_s10  ;;  %s34_s12 = int_to_ptr.vmem [resolvable:$true] %s33_s12 }
   0x3   :  { %s129_s13 = scalar_lea.vmem %s20_s10, 256  ;;  %p134_p1 = scmp.lt.s32.totalorder %s20_s10, %s20_s10 }
   0x4   :  { %p130_p0 = scmp.ne.s32.totalorder %s20_s10, %s129_s13  ;;  %p135_p2 = scmp.lt.s32.totalorder %s129_s13, %s129_s13 }
   0x6   :  { %p136_p3 = por %p135_p2, %p134_p1 }
   0x8   :  { %p137_p4 = pnand %p136_p3, %p130_p0 }
   0xa   :  { %140 = shalt.err (!%p137_p4)
}
   0xb   :  { %22 = dma.hbm_to_vmem [thread:$0]  %s191_s0, 256, %s20_s10, [#allocation4]  }
   0xc   :  { %s149_s16 = scalar_lea.vmem %s34_s12, 256  ;;  %p154_p6 = scmp.lt.s32.totalorder %s34_s12, %s34_s12 }
   0xd   :  { %p150_p5 = scmp.ne.s32.totalorder %s34_s12, %s149_s16  ;;  %p155_p7 = scmp.lt.s32.totalorder %s149_s16, %s149_s16 }
   0xf   :  { %p156_p8 = por %p155_p7, %p154_p6 }
  0x11   :  { %p157_p9 = pnand %p156_p8, %p150_p5 }
  0x13   :  { %160 = shalt.err (!%p157_p9)
}
  0x14   :  { %36 = dma.hbm_to_vmem [thread:$0]  %s192_s1, 256, %s34_s12, [#allocation6]  }
  0x15   :  { %161 = dma.done.wait [#allocation4], 256  }
  0x16   :  { %162 = vsyncadd [#allocation4], 4294967040 }
  0x17   :  { %163 = dma.done.wait [#allocation6], 256  }
  0x18   :  { %164 = vsyncadd [#allocation6], 4294967040  ;;  %v52_v0 = vld [vmem:[#allocation3] sm:$0xff]  ;;  %v74_v1 = vld [vmem:[#allocation3 + $0x8] sm:$0xff]  ;;  %vm103_vm2 = vcmask 7168  }
  0x19   :  { %v57_v2 = vand.u32 2147483647, %v52_v0  ;;  %v79_v3 = vand.u32 2147483647, %v74_v1  ;;  %v53_v14 = vld [vmem:[#allocation5] sm:$0xff]  ;;  %v75_v15 = vld [vmem:[#allocation5 + $0x8] sm:$0xff] }
  0x1a   :  { %v54_v17 = vmax.f32 %v52_v0, 0.0  ;;  %v55_v18 = vmul.f32 %v53_v14, %v52_v0  ;;  %v76_v21 = vmax.f32 %v74_v1, 0.0  ;;  %v77_v22 = vmul.f32 %v75_v15, %v74_v1 }
  0x1b   :  { %v58_v4 = vsub.f32 0.0, %v57_v2  ;;  %v80_v5 = vsub.f32 0.0, %v79_v3 }
  0x1c   :  { %v56_v26 = vsub.f32 %v54_v17, %v55_v18  ;;  %v78_v30 = vsub.f32 %v76_v21, %v77_v22 }
  0x1d   :  { %v59_v6 = vmul.f32 1.442695, %v58_v4  ;;  %v81_v7 = vmul.f32 1.442695, %v80_v5 }
  0x1f   :  { %113 = vpow2.f32 %v59_v6 }
  0x20   :  { %115 = vpow2.f32 %v81_v7 }
  0x2c   :  { %v114_v8 = vpop.eup %113 }
  0x2d   :  { %v116_v9 = vpop.eup %115  ;;  %v61_v10 = vadd.f32 1.0, %v114_v8  ;;  %v64_v12 = vmul.f32 -0.5, %v114_v8  ;;  %v67_v19 = vand.u32 2147483647, %v114_v8 }
  0x2e   :  { %v83_v11 = vadd.f32 1.0, %v116_v9  ;;  %v86_v13 = vmul.f32 -0.5, %v116_v9  ;;  %v89_v23 = vand.u32 2147483647, %v116_v9 }
  0x2f   :  { %117 = vlog2.f32 %v61_v10  ;;  %v65_v16 = vadd.f32 1.0, %v64_v12  ;;  %vm68_vm0 = vcmp.lt.f32.partialorder %v67_v19, 0.0004427343 }
  0x30   :  { %119 = vlog2.f32 %v83_v11  ;;  %v87_v20 = vadd.f32 1.0, %v86_v13  ;;  %vm90_vm1 = vcmp.lt.f32.partialorder %v89_v23, 0.0004427343 }
  0x31   :  { %v66_v24 = vmul.f32 %v114_v8, %v65_v16 }
  0x32   :  { %v88_v27 = vmul.f32 %v116_v9, %v87_v20 }
  0x3c   :  { %v118_v25 = vpop.eup %117 }
  0x3d   :  { %v120_v28 = vpop.eup %119  ;;  %v63_v29 = vmul.f32 0.6931472, %v118_v25 }
  0x3e   :  { %v85_v31 = vmul.f32 0.6931472, %v120_v28 }
  0x3f   :  { %v69_v32 = vsel %vm68_vm0, %v66_v24, %v63_v29 }
  0x40   :  { %v70_v33 = vadd.f32 %v69_v32, %v56_v26  ;;  %v91_v34 = vsel %vm90_vm1, %v88_v27, %v85_v31 }
  0x41   :  { %v92_v35 = vadd.f32 %v91_v34, %v78_v30 }
  0x43   :  { %v94_v36 = vadd.f32 %v92_v35, %v70_v33 }
  0x45   :  { %100 = vadd.xlane.f32.xlu0 %v94_v36 }
  0xce   :  { %v101_v37 = vpop.xlane.xlu0 %100 }
  0xcf   :  { %v102_v38 = vmul.f32 0.00390625, %v101_v37 }
  0xd1   :  { %104 = vst.msk [vmem:[%s193_s2] sm:$0xff] %vm103_vm2, %v102_v38 }
  0xd2   :  { %109 = vsyncpa [#allocation4], 1 }
  0xd3   :  { %110 = vsyncpa [#allocation6], 1 }

</bundles_post_ra>
